<compile_context>
chip_gen: v5e
topology: v5e:2x2
jax: 0.10.0
libtpu: 0.0.40
codegen_flags: <defaults>
</compile_context>

<pallas_src>
import jax
import jax.numpy as jnp
from jax.experimental import pallas as pl
from jax.experimental.pallas import tpu as pltpu


def _make_bce_rowsum_kernel(d_total, td, acc_w):
    """BCE row-sum kernel over [TB, TD] tiles with a lane-dense accumulator."""
    n_chunks = td // acc_w
    mask_last_d_tile = (d_total % td) != 0

    def kernel(recon_ref, x_ref, out_ref, acc_ref):
        k = pl.program_id(1)

        @pl.when(k == 0)
        def _init():
            acc_ref[...] = jnp.zeros_like(acc_ref)

        recon = recon_ref[...].astype(jnp.float32)
        x = x_ref[...].astype(jnp.float32)

        # F.binary_cross_entropy (reduction='none'):
        #   -(x * log(recon) + (1 - x) * log(1 - recon)), logs clamped at -100
        # (clamp BEFORE the multiply so recon in {0, 1} never yields 0 * inf).
        log_r = jnp.maximum(jnp.log(recon), -100.0)
        log_1mr = jnp.maximum(jnp.log(1.0 - recon), -100.0)
        bce = -(x * log_r + (1.0 - x) * log_1mr)

        if mask_last_d_tile:
            # Zero out the columns of the ragged last D tile that lie past D.
            col = jax.lax.broadcasted_iota(jnp.int32, bce.shape, 1) + k * td
            bce = jnp.where(col < d_total, bce, 0.0)

        # Lane-dense accumulation: static ACC_W-wide lane slices (VALU adds).
        s = bce[:, 0:acc_w]
        for j in range(1, n_chunks):
            s = s + bce[:, j * acc_w:(j + 1) * acc_w]
        acc_ref[...] += s

        @pl.when(k == pl.num_programs(1) - 1)
        def _finalize():
            out_ref[...] = acc_ref[...]

    return kernel


def vae_loss(recon_x, x, mu, logvar):
    """recon_x, x: [B, C, H, W] (probabilities / targets in [0, 1]);
    mu, logvar: [B, L].  Inputs may be f32 or bf16 (kernel accumulates in f32;
    pass bf16 straight from the producer, do not cast here)."""
    B = recon_x.shape[0]
    recon_flat = recon_x.reshape(B, -1)
    x_flat = x.reshape(B, -1)
    D = recon_flat.shape[1]

    # --- tile sizing (no wrapper-side padding of the big inputs) -------------
    if D >= 128:
        TD = min(4096, (D // 128) * 128)      # lane-dense, multiple of 128
    else:
        TD = D                                # block == full array dim is legal
    ACC_W = 128 if TD % 128 == 0 else TD

    if B >= 8:
        TB = min(128, (B // 8) * 8)           # sublane-aligned batch tile
        # Keep >= 2 batch tiles so both v7x TensorCores get work.
        if B >= 16 and pl.cdiv(B, TB) < 2:
            TB = max(8, ((B // 2) // 8) * 8)
    else:
        TB = B                                # block == full batch dim is legal

    grid = (pl.cdiv(B, TB), pl.cdiv(D, TD))

    in_bytes = (recon_flat.size * recon_flat.dtype.itemsize
                + x_flat.size * x_flat.dtype.itemsize)
    cost = pl.CostEstimate(
        flops=8 * B * D,
        transcendentals=2 * B * D,
        bytes_accessed=in_bytes + B * ACC_W * 4,
    )

    partials = pl.pallas_call(
        _make_bce_rowsum_kernel(D, TD, ACC_W),
        out_shape=jax.ShapeDtypeStruct((B, ACC_W), jnp.float32),
        grid_spec=pltpu.PrefetchScalarGridSpec(
            num_scalar_prefetch=0,
            grid=grid,
            in_specs=[
                pl.BlockSpec((TB, TD), lambda i, k: (i, k)),
                pl.BlockSpec((TB, TD), lambda i, k: (i, k)),
            ],
            out_specs=pl.BlockSpec((TB, ACC_W), lambda i, k: (i, 0)),
            scratch_shapes=[pltpu.VMEM((TB, ACC_W), jnp.float32)],
        ),
        compiler_params=pltpu.CompilerParams(
            dimension_semantics=("parallel", "arbitrary"),
            vmem_limit_bytes=32 * 1024 * 1024),
        cost_estimate=cost,
    )(recon_flat, x_flat)

    # Final lane reduce + tiny O(B*L) KLD + batch mean: plain XLA in the wrapper.
    recon_sum = jnp.sum(partials, axis=-1)                       # (B,)
    mu32 = mu.astype(jnp.float32)
    lv32 = logvar.astype(jnp.float32)
    kld = -0.5 * jnp.sum(1.0 + lv32 - mu32 * mu32 - jnp.exp(lv32), axis=-1)
    return jnp.mean(recon_sum + kld)


def _vae_loss_ref(recon_x, x, mu, logvar):
    B = recon_x.shape[0]
    r = recon_x.reshape(B, -1).astype(jnp.float32)
    t = x.reshape(B, -1).astype(jnp.float32)
    bce = -(t * jnp.maximum(jnp.log(r), -100.0)
            + (1.0 - t) * jnp.maximum(jnp.log(1.0 - r), -100.0))
    recon = jnp.sum(bce, axis=-1)
    kld = -0.5 * jnp.sum(1.0 + logvar - mu * mu - jnp.exp(logvar), axis=-1)
    return jnp.mean(recon + kld)


if __name__ == "__main__":
    key = jax.random.PRNGKey(0)

    # --- small shape matching the module's intent -----------------------------
    k1, k2, k3, k4 = jax.random.split(key, 4)
    B, C, H, W, L = 2, 4, 16, 16, 32
    recon_x = jax.nn.sigmoid(jax.random.normal(k1, (B, C, H, W), jnp.float32))
    x = jax.random.uniform(k2, (B, C, H, W), jnp.float32)
    mu = jax.random.normal(k3, (B, L), jnp.float32)
    logvar = jax.random.normal(k4, (B, L), jnp.float32) * 0.5

    loss = jax.block_until_ready(vae_loss(recon_x, x, mu, logvar))
    ref = jax.block_until_ready(_vae_loss_ref(recon_x, x, mu, logvar))
    assert jnp.allclose(loss, ref, rtol=1e-5, atol=1e-5), (loss, ref)

    # --- second shape exercising multi-tile grid + ragged D masking ----------
    k5, k6, k7, k8 = jax.random.split(jax.random.PRNGKey(1), 4)
    B2, C2, H2, W2, L2 = 16, 3, 30, 30, 32          # D = 2700, not 128-aligned
    recon_x2 = jax.nn.sigmoid(jax.random.normal(k5, (B2, C2, H2, W2), jnp.float32))
    x2 = jax.random.uniform(k6, (B2, C2, H2, W2), jnp.float32)
    mu2 = jax.random.normal(k7, (B2, L2), jnp.float32)
    logvar2 = jax.random.normal(k8, (B2, L2), jnp.float32) * 0.5

    loss2 = jax.block_until_ready(vae_loss(recon_x2, x2, mu2, logvar2))
    ref2 = jax.block_until_ready(_vae_loss_ref(recon_x2, x2, mu2, logvar2))
    assert jnp.allclose(loss2, ref2, rtol=1e-4, atol=1e-3), (loss2, ref2)

    print("KERNEL_OK")
</pallas_src>

<mosaic_0001>
module attributes {stable_mosaic.version = 11 : i64} {
  func.func @kernel(%arg0: i32, %arg1: i32, %arg2: memref<2x1024xf32, #tpu.memory_space<vmem>>, %arg3: memref<2x1024xf32, #tpu.memory_space<vmem>>, %arg4: memref<2x128xf32, #tpu.memory_space<vmem>>, %arg5: memref<2x128xf32, #tpu.memory_space<vmem>>) attributes {dimension_semantics = [#tpu.dimension_semantics<parallel>, #tpu.dimension_semantics<arbitrary>], iteration_bounds = array<i64: 1, 1>, scalar_prefetch = 0 : i64, scratch_operands = 1 : i64, tpu.core_type = #tpu.core_type<tc>, window_params = [{transform_indices = @transform_0, window_bounds = array<i64: 2, 1024>}, {transform_indices = @transform_1, window_bounds = array<i64: 2, 1024>}, {transform_indices = @transform_2, window_bounds = array<i64: 2, 128>}]} {
    %c0_i32 = arith.constant 0 : i32
    %0 = arith.cmpi eq, %arg1, %c0_i32 : i32
    %1 = arith.extui %0 : i1 to i32
    %c0_i32_0 = arith.constant 0 : i32
    %2 = arith.cmpi ne, %1, %c0_i32_0 : i32
    scf.if %2 {
      %cst_14 = arith.constant 0.000000e+00 : f32
      %41 = vector.broadcast %cst_14 : f32 to vector<2x128xf32>
      %c0_15 = arith.constant 0 : index
      %c0_16 = arith.constant 0 : index
      %42 = vector.load %arg5[%c0_15, %c0_16] : memref<2x128xf32, #tpu.memory_space<vmem>>, vector<2x128xf32>
      tpu.vector_store %arg5[%c0_15, %c0_16], %41 {strides = array<i32>} : memref<2x128xf32, #tpu.memory_space<vmem>>, vector<2x128xf32>,
    } else {
    }
    %c0 = arith.constant 0 : index
    %c0_1 = arith.constant 0 : index
    %3 = vector.load %arg2[%c0, %c0_1] : memref<2x1024xf32, #tpu.memory_space<vmem>>, vector<2x1024xf32>
    %c0_2 = arith.constant 0 : index
    %c0_3 = arith.constant 0 : index
    %4 = vector.load %arg3[%c0_2, %c0_3] : memref<2x1024xf32, #tpu.memory_space<vmem>>, vector<2x1024xf32>
    %5 = math.log %3 : vector<2x1024xf32>
    %cst = arith.constant -1.000000e+02 : f32
    %6 = vector.broadcast %cst : f32 to vector<2x1024xf32>
    %7 = arith.maximumf %5, %6 : vector<2x1024xf32>
    %cst_4 = arith.constant 1.000000e+00 : f32
    %8 = vector.broadcast %cst_4 : f32 to vector<2x1024xf32>
    %9 = arith.subf %8, %3 : vector<2x1024xf32>
    %10 = math.log %9 : vector<2x1024xf32>
    %cst_5 = arith.constant -1.000000e+02 : f32
    %11 = vector.broadcast %cst_5 : f32 to vector<2x1024xf32>
    %12 = arith.maximumf %10, %11 : vector<2x1024xf32>
    %13 = arith.mulf %4, %7 : vector<2x1024xf32>
    %cst_6 = arith.constant 1.000000e+00 : f32
    %14 = vector.broadcast %cst_6 : f32 to vector<2x1024xf32>
    %15 = arith.subf %14, %4 : vector<2x1024xf32>
    %16 = arith.mulf %15, %12 : vector<2x1024xf32>
    %17 = arith.addf %13, %16 : vector<2x1024xf32>
    %cst_7 = arith.constant 0.000000e+00 : f32
    %18 = vector.broadcast %cst_7 : f32 to vector<2x1024xf32>
    %19 = arith.subf %18, %17 : vector<2x1024xf32>
    %20 = vector.extract_strided_slice %19 {offsets = [0, 0], sizes = [2, 128], strides = [1, 1]} : vector<2x1024xf32> to vector<2x128xf32>
    %21 = vector.extract_strided_slice %19 {offsets = [0, 128], sizes = [2, 128], strides = [1, 1]} : vector<2x1024xf32> to vector<2x128xf32>
    %22 = arith.addf %20, %21 : vector<2x128xf32>
    %23 = vector.extract_strided_slice %19 {offsets = [0, 256], sizes = [2, 128], strides = [1, 1]} : vector<2x1024xf32> to vector<2x128xf32>
    %24 = arith.addf %22, %23 : vector<2x128xf32>
    %25 = vector.extract_strided_slice %19 {offsets = [0, 384], sizes = [2, 128], strides = [1, 1]} : vector<2x1024xf32> to vector<2x128xf32>
    %26 = arith.addf %24, %25 : vector<2x128xf32>
    %27 = vector.extract_strided_slice %19 {offsets = [0, 512], sizes = [2, 128], strides = [1, 1]} : vector<2x1024xf32> to vector<2x128xf32>
    %28 = arith.addf %26, %27 : vector<2x128xf32>
    %29 = vector.extract_strided_slice %19 {offsets = [0, 640], sizes = [2, 128], strides = [1, 1]} : vector<2x1024xf32> to vector<2x128xf32>
    %30 = arith.addf %28, %29 : vector<2x128xf32>
    %31 = vector.extract_strided_slice %19 {offsets = [0, 768], sizes = [2, 128], strides = [1, 1]} : vector<2x1024xf32> to vector<2x128xf32>
    %32 = arith.addf %30, %31 : vector<2x128xf32>
    %33 = vector.extract_strided_slice %19 {offsets = [0, 896], sizes = [2, 128], strides = [1, 1]} : vector<2x1024xf32> to vector<2x128xf32>
    %34 = arith.addf %32, %33 : vector<2x128xf32>
    %c0_8 = arith.constant 0 : index
    %c0_9 = arith.constant 0 : index
    %35 = vector.load %arg5[%c0_8, %c0_9] : memref<2x128xf32, #tpu.memory_space<vmem>>, vector<2x128xf32>
    %36 = arith.addf %35, %34 : vector<2x128xf32>
    %c0_10 = arith.constant 0 : index
    %c0_11 = arith.constant 0 : index
    %37 = vector.load %arg5[%c0_10, %c0_11] : memref<2x128xf32, #tpu.memory_space<vmem>>, vector<2x128xf32>
    tpu.vector_store %arg5[%c0_10, %c0_11], %36 {strides = array<i32>} : memref<2x128xf32, #tpu.memory_space<vmem>>, vector<2x128xf32>,
    %c0_i32_12 = arith.constant 0 : i32
    %38 = arith.cmpi eq, %arg1, %c0_i32_12 : i32
    %39 = arith.extui %38 : i1 to i32
    %c0_i32_13 = arith.constant 0 : i32
    %40 = arith.cmpi ne, %39, %c0_i32_13 : i32
    scf.if %40 {
      %c0_14 = arith.constant 0 : index
      %c0_15 = arith.constant 0 : index
      %41 = vector.load %arg5[%c0_14, %c0_15] : memref<2x128xf32, #tpu.memory_space<vmem>>, vector<2x128xf32>
      %c0_16 = arith.constant 0 : index
      %c0_17 = arith.constant 0 : index
      %42 = vector.load %arg4[%c0_16, %c0_17] : memref<2x128xf32, #tpu.memory_space<vmem>>, vector<2x128xf32>
      tpu.vector_store %arg4[%c0_16, %c0_17], %41 {strides = array<i32>} : memref<2x128xf32, #tpu.memory_space<vmem>>, vector<2x128xf32>,
    } else {
    }
    return
  }
  func.func @transform_0(%arg0: i32, %arg1: i32) -> (i32, i32) {
    %c0_i32 = arith.constant 0 : i32
    return %arg0, %arg1 : i32, i32
  }
  func.func @transform_1(%arg0: i32, %arg1: i32) -> (i32, i32) {
    %c0_i32 = arith.constant 0 : i32
    return %arg0, %arg1 : i32, i32
  }
  func.func @transform_2(%arg0: i32, %arg1: i32) -> (i32, i32) {
    %c0_i32 = arith.constant 0 : i32
    %c0_i32_0 = arith.constant 0 : i32
    return %arg0, %c0_i32 : i32, i32
  }
}

</mosaic_0001>

<bundles_post_ra>
// kernel: tpu_custom_call.1
= control target key start
LH: loop header
LB: loop body
LE: loop exit
PB: predicated region body
PF: predicated region fallthrough
CT: control target
= control target key end

     0   :  { %7 = vsyncpa [#allocation4], 0  ;;  %s238_s0 = inlined_call_operand.hbm [shape: f32[2,1024], index: 0, kind: input, shape index: {}]   ;;  %s239_s1 = inlined_call_operand.hbm [shape: f32[2,1024], index: 1, kind: input, shape index: {}]   ;;  %s240_s2 = inlined_call_operand.hbm [shape: f32[2,128], index: 2, kind: output, shape index: {}]  }
   0x1   :  { %8 = vsyncpa [#allocation7], 0 }
   0x2   :  { %9 = vsyncpa [#allocation5], 0  ;;  %s15_s11 = sshll.u32 %s238_s0, 4  ;;  %s210_s12 = smov [#allocation3]   ;;  %s16_s11 = int_to_ptr.hbm [resolvable:$true] %s15_s11 }
   0x3   :  { %s17_s13 = sshll.u32 %s210_s12, 4  ;;  %s26_s16 = sshll.u32 %s239_s1, 4  ;;  %s18_s13 = int_to_ptr.vmem [resolvable:$true] %s17_s13  ;;  %s27_s16 = int_to_ptr.hbm [resolvable:$true] %s26_s16 }
   0x4   :  { %20 = dma.hbm_to_vmem [thread:$0]  %s16_s11, 256, %s18_s13, [#allocation4]  }
   0x5   :  { %s211_s17 = smov [#allocation6]  }
   0x6   :  { %s28_s18 = sshll.u32 %s211_s17, 4  ;;  %s29_s18 = int_to_ptr.vmem [resolvable:$true] %s28_s18 }
   0x7   :  { %31 = dma.hbm_to_vmem [thread:$0]  %s27_s16, 256, %s29_s18, [#allocation7]  }
   0x8   :  { %204 = dma.done.wait [#allocation4], 256  }
   0x9   :  { %205 = vsyncadd [#allocation4], 4294967040 }
   0xa   :  { %206 = dma.done.wait [#allocation7], 256  }
   0xb   :  { %207 = vsyncadd [#allocation7], 4294967040  ;;  %v212_v0 = vmov 0.0   ;;  %v45_v1 = vld [vmem:[#allocation3] sm:$0xff]  ;;  %v46_v2 = vld [vmem:[#allocation3 + $0x8] sm:$0xff]  ;;  %s213_s0 = smov [#allocation8]  }
   0xc   :  { %44 = vst [vmem:[#allocation2] sm:$0x3] %v212_v0  ;;  %124 = vlog2.f32 %v45_v1  ;;  %v55_v3 = vsub.f32 1.0, %v45_v1  ;;  %v56_v4 = vsub.f32 1.0, %v46_v2  ;;  %v47_v6 = vld [vmem:[#allocation6] sm:$0xff]  ;;  %v48_v8 = vld [vmem:[#allocation6 + $0x8] sm:$0xff] }
   0xd   :  { %126 = vlog2.f32 %v46_v2  ;;  %v65_v15 = vsub.f32 1.0, %v47_v6  ;;  %v66_v18 = vsub.f32 1.0, %v48_v8  ;;  %s107_s1 = sshll.u32 %s213_s0, 4  ;;  %s109_s21 = sshll.u32 %s240_s2, 4  ;;  %s108_s1 = int_to_ptr.vmem [resolvable:$true] %s107_s1  ;;  %s110_s21 = int_to_ptr.hbm [resolvable:$true] %s109_s21 }
   0xe   :  { %128 = vlog2.f32 %v55_v3 }
   0xf   :  { %130 = vlog2.f32 %v56_v4 }
  0x12   :  { %v125_v5 = vpop.eup %124 }
  0x13   :  { %v127_v7 = vpop.eup %126  ;;  %v50_v9 = vmul.f32 0.6931472, %v125_v5  ;;  %v94_v41 = vld [vmem:[#allocation2] sm:$0x3] }
  0x14   :  { %v129_v10 = vpop.eup %128  ;;  %v52_v11 = vmul.f32 0.6931472, %v127_v7 }
  0x15   :  { %v131_v12 = vpop.eup %130  ;;  %v53_v13 = vmax.f32 %v50_v9, -100.0  ;;  %v58_v14 = vmul.f32 0.6931472, %v129_v10 }
  0x16   :  { %v54_v16 = vmax.f32 %v52_v11, -100.0  ;;  %v60_v17 = vmul.f32 0.6931472, %v131_v12 }
  0x17   :  { %v61_v19 = vmax.f32 %v58_v14, -100.0  ;;  %v63_v20 = vmul.f32 %v53_v13, %v47_v6 }
  0x18   :  { %v62_v21 = vmax.f32 %v60_v17, -100.0  ;;  %v64_v22 = vmul.f32 %v54_v16, %v48_v8 }
  0x19   :  { %v67_v23 = vmul.f32 %v65_v15, %v61_v19 }
  0x1a   :  { %v68_v24 = vmul.f32 %v66_v18, %v62_v21 }
  0x1b   :  { %v69_v25 = vadd.f32 %v67_v23, %v63_v20 }
  0x1c   :  { %v70_v26 = vadd.f32 %v68_v24, %v64_v22 }
  0x1d   :  { %v71_v27 = vsub.f32 0.0, %v69_v25 }
  0x1e   :  { %v72_v30 = vsub.f32 0.0, %v70_v26 }
  0x1f   :  { %v74_v28 = vrot.slane %v71_v27, 2  ;;  %v77_v29 = vrot.slane %v71_v27, 4  ;;  %v80_v32 = vrot.slane %v71_v27, 6 }
  0x20   :  { %v85_v35 = vrot.slane %v72_v30, 2  ;;  %v88_v37 = vrot.slane %v72_v30, 4  ;;  %v91_v39 = vrot.slane %v72_v30, 6 }
  0x21   :  { %v76_v31 = vadd.f32 %v74_v28, %v71_v27 }
  0x23   :  { %v79_v33 = vadd.f32 %v77_v29, %v76_v31 }
  0x25   :  { %v82_v34 = vadd.f32 %v80_v32, %v79_v33 }
  0x27   :  { %v83_v36 = vadd.f32 %v82_v34, %v72_v30 }
  0x29   :  { %v87_v38 = vadd.f32 %v85_v35, %v83_v36 }
  0x2b   :  { %v90_v40 = vadd.f32 %v88_v37, %v87_v38 }
  0x2d   :  { %v93_v42 = vadd.f32 %v91_v39, %v90_v40 }
  0x2f   :  { %v95_v43 = vadd.f32 %v94_v41, %v93_v42 }
  0x31   :  { %96 = vst [vmem:[#allocation2] sm:$0x3] %v95_v43 }
  0x38   :  { %v100_v44 = vld [vmem:[#allocation2] sm:$0x3] }
  0x39   :  { %101 = vst [vmem:[#allocation8] sm:$0x3] %v100_v44 }
  0x3a   :  { %112 = dma.vmem_to_hbm [thread:$0]  %s108_s1, 32, %s110_s21, [#allocation5]  }
  0x3b   :  { %208 = dma.done.wait [#allocation5], 32  }
  0x3c   :  { %209 = vsyncadd [#allocation5], 4294967264 }
  0x3d   :  { %117 = vsyncpa [#allocation4], 1 }
  0x3e   :  { %118 = vsyncpa [#allocation7], 1 }
  0x3f   :  { %119 = vsyncpa [#allocation5], 1 }

</bundles_post_ra>
